<compile_context>
chip_gen: v6e
topology: v6e:2x2x1
jax: 0.10.0
libtpu: 0.0.40
codegen_flags: <defaults>
</compile_context>

<pallas_src>
import functools

import jax
import jax.numpy as jnp
from jax.experimental import pallas as pl
from jax.experimental.pallas import tpu as pltpu

NEG_SLOPE = 0.2   # LeakyReLU slope used throughout the module
BN_EPS = 1e-5


def _lrelu(x):
    return jnp.where(x >= 0, x, NEG_SLOPE * x)


# ----------------------------------------------------------------------------
# Fused kernel: full FCBlock forward for one (batch element, T-tile).
# ----------------------------------------------------------------------------
def fcblock_kernel(x_ref, w1_ref, b1_ref, *rest, block_num):
    # x_ref : (1, C_in, tT) f32          w1_ref: (H, C_in) bf16 (BN-folded)
    # b1_ref: (H, 1) f32
    # [bw_ref: (2B, H, H) bf16, bb_ref: (2B, H, 1) f32]   (only if block_num>0)
    # w2_ref: (C_out, H) bf16            b2_ref: (C_out, 1) f32
    # o_ref : (1, C_out, tT) f32
    if block_num > 0:
        bw_ref, bb_ref, w2_ref, b2_ref, o_ref = rest
    else:
        bw_ref = bb_ref = None
        w2_ref, b2_ref, o_ref = rest

    x = x_ref[0].astype(jnp.bfloat16)                       # (C_in, tT)
    h = jnp.dot(w1_ref[...], x, preferred_element_type=jnp.float32)
    h = _lrelu(h + b1_ref[...])                             # fc_1 + bn_1 + LReLU

    # TODO(synk): switch to lax.fori_loop with dynamic bw_ref indexing if
    # block_num ever grows beyond ~4 (unrolling is fine at block_num=2).
    for blk in range(block_num):                            # residual Linear blocks
        y = jnp.dot(bw_ref[2 * blk], h.astype(jnp.bfloat16),
                    preferred_element_type=jnp.float32)
        y = _lrelu(y + bb_ref[2 * blk])
        y = jnp.dot(bw_ref[2 * blk + 1], y.astype(jnp.bfloat16),
                    preferred_element_type=jnp.float32)
        y = _lrelu(y + bb_ref[2 * blk + 1])
        h = h + y                                           # residual in f32

    o = jnp.dot(w2_ref[...], h.astype(jnp.bfloat16),        # fc_2 (no BN / act)
                preferred_element_type=jnp.float32)
    o_ref[0] = (o + b2_ref[...]).astype(o_ref.dtype)


# ----------------------------------------------------------------------------
# VMEM budgeting / tiling helpers
# ----------------------------------------------------------------------------
def _rup(x, m):
    return -(-x // m) * m


def _detect_vmem_bytes():
    try:
        return int(pltpu.get_tpu_info().vmem_capacity_bytes)
    except Exception:
        return 64 << 20            # conservative (v7x per-TC VMEM)


def _vmem_tile_bytes(shape, itemsize):
    """Conservative padded VMEM footprint of one buffer of `shape`."""
    if len(shape) < 2:
        rows, cols, lead = 1, shape[0], 1
    else:
        rows, cols = shape[-2], shape[-1]
        lead = 1
        for d in shape[:-2]:
            lead *= d
    return lead * _rup(rows, 8) * _rup(cols, 128) * itemsize


def _weights_vmem_bytes(params, block_num):
    total = _vmem_tile_bytes(params["fc1_w"].shape, 2)
    total += _vmem_tile_bytes(params["fc1_b"].shape, 4)
    if block_num > 0:
        total += _vmem_tile_bytes(params["blk_w"].shape, 2)
        total += _vmem_tile_bytes(params["blk_b"].shape, 4)
    total += _vmem_tile_bytes(params["fc2_w"].shape, 2)
    total += _vmem_tile_bytes(params["fc2_b"].shape, 4)
    return total


def _choose_t_tile(t, c_in, c_out, hidden, vmem_cap, weight_bytes, t_tile_max):
    """Pick the lane-tile width along T from the VMEM budget."""
    bytes_per_col = (2 * 4 * _rup(c_in, 8)        # input tile (f32, double-buffered)
                     + 2 * 4 * _rup(c_out, 8)     # output tile (f32, double-buffered)
                     + 4 * _rup(hidden, 8) * 3    # f32 temporaries h / y / slack
                     + 2 * _rup(hidden, 8) * 2)   # bf16 MXU-operand copies
    budget = vmem_cap - weight_bytes - (8 << 20)  # headroom for compiler scratch
    cap = budget // max(bytes_per_col, 1)
    cap = max(128, (cap // 128) * 128)
    cap = min(cap, t_tile_max)
    if t <= cap:
        return t, 1, bytes_per_col                # one full-width tile per batch elem
    return cap, pl.cdiv(t, cap), bytes_per_col    # ragged last tile masked by Pallas


# ----------------------------------------------------------------------------
# Parameter construction (PyTorch-like Conv1d(kernel_size=1) init, BN folded)
# ----------------------------------------------------------------------------
def make_fcblock_params(key, channel_in, channel_out, linear_size, block_num):
    keys = jax.random.split(key, 2 + 2 * block_num)

    def conv1x1(k, c_in, c_out):
        # Conv1d weight (c_out, c_in, 1) stored as (c_out, c_in); bias (c_out, 1).
        kw, kb = jax.random.split(k)
        bound = 1.0 / jnp.sqrt(jnp.float32(c_in))
        w = jax.random.uniform(kw, (c_out, c_in), jnp.float32, -bound, bound)
        b = jax.random.uniform(kb, (c_out, 1), jnp.float32, -bound, bound)
        return w, b

    def bn_fold(w, b, c):
        # TODO(synk): real inference must fold the *trained* running stats and
        # gamma/beta here; fresh-init stats (mean=0, var=1) are used for the demo.
        gamma = jnp.ones((c, 1), jnp.float32)
        beta = jnp.zeros((c, 1), jnp.float32)
        r_mean = jnp.zeros((c, 1), jnp.float32)
        r_var = jnp.ones((c, 1), jnp.float32)
        scale = gamma / jnp.sqrt(r_var + BN_EPS)
        shift = beta - r_mean * scale
        return w * scale, b * scale + shift

    params = {}
    w1, b1 = conv1x1(keys[0], channel_in, linear_size)
    w1, b1 = bn_fold(w1, b1, linear_size)
    params["fc1_w"] = w1.astype(jnp.bfloat16)
    params["fc1_b"] = b1

    if block_num > 0:
        blk_w, blk_b = [], []
        for i in range(block_num):
            for j in range(2):
                w, b = conv1x1(keys[2 + 2 * i + j], linear_size, linear_size)
                w, b = bn_fold(w, b, linear_size)
                blk_w.append(w)
                blk_b.append(b)
        params["blk_w"] = jnp.stack(blk_w).astype(jnp.bfloat16)
        params["blk_b"] = jnp.stack(blk_b)

    w2, b2 = conv1x1(keys[1], linear_size, channel_out)
    params["fc2_w"] = w2.astype(jnp.bfloat16)
    params["fc2_b"] = b2
    return params


# ----------------------------------------------------------------------------
# Full FCBlock forward (one fused pallas_call, native (N, C, T) layout)
# ----------------------------------------------------------------------------
def fcblock_forward(x_nct, params, block_num, *,
                    single_buffer_weights=True, t_tile_max=2048):
    n, c_in, t = x_nct.shape
    hidden = params["fc1_w"].shape[0]
    c_out = params["fc2_w"].shape[0]
    nblk2 = params["blk_w"].shape[0] if block_num > 0 else 0

    vmem_cap = _detect_vmem_bytes()
    wbuf = 1 if single_buffer_weights else 2
    weight_bytes = _weights_vmem_bytes(params, block_num) * wbuf
    t_tile, n_t, bytes_per_col = _choose_t_tile(
        t, c_in, c_out, hidden, vmem_cap, weight_bytes, t_tile_max)

    # Explicit scoped-VMEM limit (defaults are 16/32 MiB and would block large
    # hidden sizes / large tiles); clamp to the detected capacity.
    usage = weight_bytes + bytes_per_col * t_tile + (4 << 20)
    vmem_limit = int(min(vmem_cap, max(2 * usage, 32 << 20)))

    def invariant(shape):
        """Grid-invariant, VMEM-resident operand (fetched once)."""
        idx = lambda *_: (0,) * len(shape)
        if single_buffer_weights:
            return pl.BlockSpec(shape, idx, pipeline_mode=pl.Buffered(1))
        return pl.BlockSpec(shape, idx)

    in_specs = [
        pl.BlockSpec((1, c_in, t_tile), lambda ni, ti: (ni, 0, ti)),  # activations
        invariant((hidden, c_in)),                                    # fc1 W (BN folded)
        invariant((hidden, 1)),                                       # fc1 b
    ]
    args = [x_nct, params["fc1_w"], params["fc1_b"]]
    if block_num > 0:
        in_specs += [invariant((nblk2, hidden, hidden)),              # stacked block Ws
                     invariant((nblk2, hidden, 1))]                   # stacked block bs
        args += [params["blk_w"], params["blk_b"]]
    in_specs += [invariant((c_out, hidden)),                          # fc2 W
                 invariant((c_out, 1))]                               # fc2 b
    args += [params["fc2_w"], params["fc2_b"]]

    kernel = functools.partial(fcblock_kernel, block_num=block_num)
    return pl.pallas_call(
        kernel,
        out_shape=jax.ShapeDtypeStruct((n, c_out, t), jnp.float32),
        grid=(n, n_t),
        in_specs=in_specs,
        out_specs=pl.BlockSpec((1, c_out, t_tile), lambda ni, ti: (ni, 0, ti)),
        compiler_params=pltpu.CompilerParams(
            dimension_semantics=("parallel", "parallel"),
            vmem_limit_bytes=vmem_limit),
    )(*args)


# ----------------------------------------------------------------------------
# Pure-JAX reference (same bf16-quantized weights, f32 activations throughout)
# ----------------------------------------------------------------------------
def fcblock_reference(x_nct, params, block_num):
    w1 = params["fc1_w"].astype(jnp.float32)
    h = _lrelu(jnp.einsum("hc,nct->nht", w1, x_nct) + params["fc1_b"][None])
    for i in range(block_num):
        wa = params["blk_w"][2 * i].astype(jnp.float32)
        wb = params["blk_w"][2 * i + 1].astype(jnp.float32)
        y = _lrelu(jnp.einsum("oc,nct->not", wa, h) + params["blk_b"][2 * i][None])
        y = _lrelu(jnp.einsum("oc,nct->not", wb, y) + params["blk_b"][2 * i + 1][None])
        h = h + y
    w2 = params["fc2_w"].astype(jnp.float32)
    return jnp.einsum("oc,nct->not", w2, h) + params["fc2_b"][None]


if __name__ == "__main__":
    # Small, module-consistent shapes: x is (batch, channel_in, T)
    channel_in, channel_out = 4, 6
    linear_size, block_num = 32, 2
    N, T = 2, 16

    key = jax.random.PRNGKey(0)
    kx, kp = jax.random.split(key)
    x = jax.random.normal(kx, (N, channel_in, T), jnp.float32)
    params = make_fcblock_params(kp, channel_in, channel_out, linear_size, block_num)

    try:
        out = fcblock_forward(x, params, block_num, single_buffer_weights=True)
        out = jax.block_until_ready(out)
    except Exception:
        # Fallback for jax builds without BlockSpec(pipeline_mode=...) support.
        out = fcblock_forward(x, params, block_num, single_buffer_weights=False)
        out = jax.block_until_ready(out)

    assert out.shape == (N, channel_out, T), out.shape

    # Loose tolerance: the kernel casts activations to bf16 at the MXU inputs.
    ref = fcblock_reference(x, params, block_num)
    max_err = float(jnp.max(jnp.abs(out - ref)))
    assert jnp.allclose(out, ref, rtol=5e-2, atol=5e-2), max_err

    # TODO(synk): dropout is omitted (eval-mode identity); training-mode dropout
    # and training-mode BatchNorm (batch statistics) are not implemented.
    print("KERNEL_OK")
</pallas_src>

<mosaic_0001>
module attributes {stable_mosaic.version = 11 : i64} {
  func.func @fcblock_kernel(%arg0: i32, %arg1: i32, %arg2: memref<1x4x16xf32, #tpu.memory_space<vmem>>, %arg3: memref<32x4xbf16, #tpu.memory_space<vmem>>, %arg4: memref<32x1xf32, #tpu.memory_space<vmem>>, %arg5: memref<4x32x32xbf16, #tpu.memory_space<vmem>>, %arg6: memref<4x32x1xf32, #tpu.memory_space<vmem>>, %arg7: memref<6x32xbf16, #tpu.memory_space<vmem>>, %arg8: memref<6x1xf32, #tpu.memory_space<vmem>>, %arg9: memref<1x6x16xf32, #tpu.memory_space<vmem>>) attributes {dimension_semantics = [#tpu.dimension_semantics<parallel>, #tpu.dimension_semantics<parallel>], iteration_bounds = array<i64: 2, 1>, scalar_prefetch = 0 : i64, scratch_operands = 0 : i64, tpu.core_type = #tpu.core_type<tc>, window_params = [{transform_indices = @transform_0, window_bounds = array<i64: 1, 4, 16>}, {pipeline_mode = #tpu.pipeline_mode<synchronous>, transform_indices = @transform_1, window_bounds = array<i64: 32, 4>}, {pipeline_mode = #tpu.pipeline_mode<synchronous>, transform_indices = @transform_2, window_bounds = array<i64: 32, 1>}, {pipeline_mode = #tpu.pipeline_mode<synchronous>, transform_indices = @transform_3, window_bounds = array<i64: 4, 32, 32>}, {pipeline_mode = #tpu.pipeline_mode<synchronous>, transform_indices = @transform_4, window_bounds = array<i64: 4, 32, 1>}, {pipeline_mode = #tpu.pipeline_mode<synchronous>, transform_indices = @transform_5, window_bounds = array<i64: 6, 32>}, {pipeline_mode = #tpu.pipeline_mode<synchronous>, transform_indices = @transform_6, window_bounds = array<i64: 6, 1>}, {transform_indices = @transform_7, window_bounds = array<i64: 1, 6, 16>}]} {
    %c0 = arith.constant 0 : index
    %c0_0 = arith.constant 0 : index
    %c0_1 = arith.constant 0 : index
    %0 = vector.load %arg2[%c0, %c0_0, %c0_1] : memref<1x4x16xf32, #tpu.memory_space<vmem>>, vector<1x4x16xf32>
    %1 = vector.shape_cast %0 : vector<1x4x16xf32> to vector<4x16xf32>
    %2 = arith.truncf %1 : vector<4x16xf32> to vector<4x16xbf16>
    %c0_2 = arith.constant 0 : index
    %c0_3 = arith.constant 0 : index
    %3 = vector.load %arg3[%c0_2, %c0_3] : memref<32x4xbf16, #tpu.memory_space<vmem>>, vector<32x4xbf16>
    %cst = arith.constant dense<0.000000e+00> : vector<32x16xf32>
    %4 = tpu.matmul %3, %2, %cst {dimension_numbers = #tpu.dot_dimension_numbers<[1], [0], [0], [1], [0, 0, 1, 1], [], []>} : vector<32x4xbf16>, vector<4x16xbf16>, vector<32x16xf32> -> vector<32x16xf32>
    %c0_4 = arith.constant 0 : index
    %c0_5 = arith.constant 0 : index
    %5 = vector.load %arg4[%c0_4, %c0_5] : memref<32x1xf32, #tpu.memory_space<vmem>>, vector<32x1xf32>
    %6 = vector.broadcast %5 : vector<32x1xf32> to vector<32x16xf32>
    %7 = arith.addf %4, %6 : vector<32x16xf32>
    %cst_6 = arith.constant 0.000000e+00 : f32
    %8 = vector.broadcast %cst_6 : f32 to vector<32x16xf32>
    %9 = arith.cmpf oge, %7, %8 : vector<32x16xf32>
    %cst_7 = arith.constant 2.000000e-01 : f32
    %10 = vector.broadcast %cst_7 : f32 to vector<32x16xf32>
    %11 = arith.mulf %10, %7 : vector<32x16xf32>
    %12 = arith.select %9, %7, %11 : vector<32x16xi1>, vector<32x16xf32>
    %c0_8 = arith.constant 0 : index
    %c0_9 = arith.constant 0 : index
    %c0_10 = arith.constant 0 : index
    %13 = vector.load %arg5[%c0_8, %c0_9, %c0_10] : memref<4x32x32xbf16, #tpu.memory_space<vmem>>, vector<1x32x32xbf16>
    %14 = vector.shape_cast %13 : vector<1x32x32xbf16> to vector<32x32xbf16>
    %15 = arith.truncf %12 : vector<32x16xf32> to vector<32x16xbf16>
    %cst_11 = arith.constant dense<0.000000e+00> : vector<32x16xf32>
    %16 = tpu.matmul %14, %15, %cst_11 {dimension_numbers = #tpu.dot_dimension_numbers<[1], [0], [0], [1], [0, 0, 1, 1], [], []>} : vector<32x32xbf16>, vector<32x16xbf16>, vector<32x16xf32> -> vector<32x16xf32>
    %c0_12 = arith.constant 0 : index
    %c0_13 = arith.constant 0 : index
    %c0_14 = arith.constant 0 : index
    %17 = vector.load %arg6[%c0_12, %c0_13, %c0_14] : memref<4x32x1xf32, #tpu.memory_space<vmem>>, vector<1x32x1xf32>
    %18 = vector.shape_cast %17 : vector<1x32x1xf32> to vector<32x1xf32>
    %19 = vector.broadcast %18 : vector<32x1xf32> to vector<32x16xf32>
    %20 = arith.addf %16, %19 : vector<32x16xf32>
    %cst_15 = arith.constant 0.000000e+00 : f32
    %21 = vector.broadcast %cst_15 : f32 to vector<32x16xf32>
    %22 = arith.cmpf oge, %20, %21 : vector<32x16xf32>
    %cst_16 = arith.constant 2.000000e-01 : f32
    %23 = vector.broadcast %cst_16 : f32 to vector<32x16xf32>
    %24 = arith.mulf %23, %20 : vector<32x16xf32>
    %25 = arith.select %22, %20, %24 : vector<32x16xi1>, vector<32x16xf32>
    %c1 = arith.constant 1 : index
    %c0_17 = arith.constant 0 : index
    %c0_18 = arith.constant 0 : index
    %26 = vector.load %arg5[%c1, %c0_17, %c0_18] : memref<4x32x32xbf16, #tpu.memory_space<vmem>>, vector<1x32x32xbf16>
    %27 = vector.shape_cast %26 : vector<1x32x32xbf16> to vector<32x32xbf16>
    %28 = arith.truncf %25 : vector<32x16xf32> to vector<32x16xbf16>
    %cst_19 = arith.constant dense<0.000000e+00> : vector<32x16xf32>
    %29 = tpu.matmul %27, %28, %cst_19 {dimension_numbers = #tpu.dot_dimension_numbers<[1], [0], [0], [1], [0, 0, 1, 1], [], []>} : vector<32x32xbf16>, vector<32x16xbf16>, vector<32x16xf32> -> vector<32x16xf32>
    %c1_20 = arith.constant 1 : index
    %c0_21 = arith.constant 0 : index
    %c0_22 = arith.constant 0 : index
    %30 = vector.load %arg6[%c1_20, %c0_21, %c0_22] : memref<4x32x1xf32, #tpu.memory_space<vmem>>, vector<1x32x1xf32>
    %31 = vector.shape_cast %30 : vector<1x32x1xf32> to vector<32x1xf32>
    %32 = vector.broadcast %31 : vector<32x1xf32> to vector<32x16xf32>
    %33 = arith.addf %29, %32 : vector<32x16xf32>
    %cst_23 = arith.constant 0.000000e+00 : f32
    %34 = vector.broadcast %cst_23 : f32 to vector<32x16xf32>
    %35 = arith.cmpf oge, %33, %34 : vector<32x16xf32>
    %cst_24 = arith.constant 2.000000e-01 : f32
    %36 = vector.broadcast %cst_24 : f32 to vector<32x16xf32>
    %37 = arith.mulf %36, %33 : vector<32x16xf32>
    %38 = arith.select %35, %33, %37 : vector<32x16xi1>, vector<32x16xf32>
    %39 = arith.addf %12, %38 : vector<32x16xf32>
    %c2 = arith.constant 2 : index
    %c0_25 = arith.constant 0 : index
    %c0_26 = arith.constant 0 : index
    %40 = vector.load %arg5[%c2, %c0_25, %c0_26] : memref<4x32x32xbf16, #tpu.memory_space<vmem>>, vector<1x32x32xbf16>
    %41 = vector.shape_cast %40 : vector<1x32x32xbf16> to vector<32x32xbf16>
    %42 = arith.truncf %39 : vector<32x16xf32> to vector<32x16xbf16>
    %cst_27 = arith.constant dense<0.000000e+00> : vector<32x16xf32>
    %43 = tpu.matmul %41, %42, %cst_27 {dimension_numbers = #tpu.dot_dimension_numbers<[1], [0], [0], [1], [0, 0, 1, 1], [], []>} : vector<32x32xbf16>, vector<32x16xbf16>, vector<32x16xf32> -> vector<32x16xf32>
    %c2_28 = arith.constant 2 : index
    %c0_29 = arith.constant 0 : index
    %c0_30 = arith.constant 0 : index
    %44 = vector.load %arg6[%c2_28, %c0_29, %c0_30] : memref<4x32x1xf32, #tpu.memory_space<vmem>>, vector<1x32x1xf32>
    %45 = vector.shape_cast %44 : vector<1x32x1xf32> to vector<32x1xf32>
    %46 = vector.broadcast %45 : vector<32x1xf32> to vector<32x16xf32>
    %47 = arith.addf %43, %46 : vector<32x16xf32>
    %cst_31 = arith.constant 0.000000e+00 : f32
    %48 = vector.broadcast %cst_31 : f32 to vector<32x16xf32>
    %49 = arith.cmpf oge, %47, %48 : vector<32x16xf32>
    %cst_32 = arith.constant 2.000000e-01 : f32
    %50 = vector.broadcast %cst_32 : f32 to vector<32x16xf32>
    %51 = arith.mulf %50, %47 : vector<32x16xf32>
    %52 = arith.select %49, %47, %51 : vector<32x16xi1>, vector<32x16xf32>
    %c3 = arith.constant 3 : index
    %c0_33 = arith.constant 0 : index
    %c0_34 = arith.constant 0 : index
    %53 = vector.load %arg5[%c3, %c0_33, %c0_34] : memref<4x32x32xbf16, #tpu.memory_space<vmem>>, vector<1x32x32xbf16>
    %54 = vector.shape_cast %53 : vector<1x32x32xbf16> to vector<32x32xbf16>
    %55 = arith.truncf %52 : vector<32x16xf32> to vector<32x16xbf16>
    %cst_35 = arith.constant dense<0.000000e+00> : vector<32x16xf32>
    %56 = tpu.matmul %54, %55, %cst_35 {dimension_numbers = #tpu.dot_dimension_numbers<[1], [0], [0], [1], [0, 0, 1, 1], [], []>} : vector<32x32xbf16>, vector<32x16xbf16>, vector<32x16xf32> -> vector<32x16xf32>
    %c3_36 = arith.constant 3 : index
    %c0_37 = arith.constant 0 : index
    %c0_38 = arith.constant 0 : index
    %57 = vector.load %arg6[%c3_36, %c0_37, %c0_38] : memref<4x32x1xf32, #tpu.memory_space<vmem>>, vector<1x32x1xf32>
    %58 = vector.shape_cast %57 : vector<1x32x1xf32> to vector<32x1xf32>
    %59 = vector.broadcast %58 : vector<32x1xf32> to vector<32x16xf32>
    %60 = arith.addf %56, %59 : vector<32x16xf32>
    %cst_39 = arith.constant 0.000000e+00 : f32
    %61 = vector.broadcast %cst_39 : f32 to vector<32x16xf32>
    %62 = arith.cmpf oge, %60, %61 : vector<32x16xf32>
    %cst_40 = arith.constant 2.000000e-01 : f32
    %63 = vector.broadcast %cst_40 : f32 to vector<32x16xf32>
    %64 = arith.mulf %63, %60 : vector<32x16xf32>
    %65 = arith.select %62, %60, %64 : vector<32x16xi1>, vector<32x16xf32>
    %66 = arith.addf %39, %65 : vector<32x16xf32>
    %c0_41 = arith.constant 0 : index
    %c0_42 = arith.constant 0 : index
    %67 = vector.load %arg7[%c0_41, %c0_42] : memref<6x32xbf16, #tpu.memory_space<vmem>>, vector<6x32xbf16>
    %68 = arith.truncf %66 : vector<32x16xf32> to vector<32x16xbf16>
    %cst_43 = arith.constant dense<0.000000e+00> : vector<6x16xf32>
    %69 = tpu.matmul %67, %68, %cst_43 {dimension_numbers = #tpu.dot_dimension_numbers<[1], [0], [0], [1], [0, 0, 1, 1], [], []>} : vector<6x32xbf16>, vector<32x16xbf16>, vector<6x16xf32> -> vector<6x16xf32>
    %c0_44 = arith.constant 0 : index
    %c0_45 = arith.constant 0 : index
    %70 = vector.load %arg8[%c0_44, %c0_45] : memref<6x1xf32, #tpu.memory_space<vmem>>, vector<6x1xf32>
    %71 = vector.broadcast %70 : vector<6x1xf32> to vector<6x16xf32>
    %72 = arith.addf %69, %71 : vector<6x16xf32>
    %c0_46 = arith.constant 0 : index
    %c0_47 = arith.constant 0 : index
    %c0_48 = arith.constant 0 : index
    %73 = vector.load %arg9[%c0_46, %c0_47, %c0_48] : memref<1x6x16xf32, #tpu.memory_space<vmem>>, vector<1x6x16xf32>
    %74 = vector.shape_cast %73 : vector<1x6x16xf32> to vector<6x16xf32>
    %75 = vector.shape_cast %72 : vector<6x16xf32> to vector<1x6x16xf32>
    tpu.vector_store %arg9[%c0_46, %c0_47, %c0_48], %75 {strides = array<i32>} : memref<1x6x16xf32, #tpu.memory_space<vmem>>, vector<1x6x16xf32>,
    return
  }
  func.func @transform_0(%arg0: i32, %arg1: i32) -> (i32, i32, i32) {
    %c0_i32 = arith.constant 0 : i32
    %c0_i32_0 = arith.constant 0 : i32
    return %arg0, %c0_i32, %arg1 : i32, i32, i32
  }
  func.func @transform_1(%arg0: i32, %arg1: i32) -> (i32, i32) {
    %c0_i32 = arith.constant 0 : i32
    %c0_i32_0 = arith.constant 0 : i32
    %c0_i32_1 = arith.constant 0 : i32
    return %c0_i32, %c0_i32_0 : i32, i32
  }
  func.func @transform_2(%arg0: i32, %arg1: i32) -> (i32, i32) {
    %c0_i32 = arith.constant 0 : i32
    %c0_i32_0 = arith.constant 0 : i32
    %c0_i32_1 = arith.constant 0 : i32
    return %c0_i32, %c0_i32_0 : i32, i32
  }
  func.func @transform_3(%arg0: i32, %arg1: i32) -> (i32, i32, i32) {
    %c0_i32 = arith.constant 0 : i32
    %c0_i32_0 = arith.constant 0 : i32
    %c0_i32_1 = arith.constant 0 : i32
    %c0_i32_2 = arith.constant 0 : i32
    return %c0_i32, %c0_i32_0, %c0_i32_1 : i32, i32, i32
  }
  func.func @transform_4(%arg0: i32, %arg1: i32) -> (i32, i32, i32) {
    %c0_i32 = arith.constant 0 : i32
    %c0_i32_0 = arith.constant 0 : i32
    %c0_i32_1 = arith.constant 0 : i32
    %c0_i32_2 = arith.constant 0 : i32
    return %c0_i32, %c0_i32_0, %c0_i32_1 : i32, i32, i32
  }
  func.func @transform_5(%arg0: i32, %arg1: i32) -> (i32, i32) {
    %c0_i32 = arith.constant 0 : i32
    %c0_i32_0 = arith.constant 0 : i32
    %c0_i32_1 = arith.constant 0 : i32
    return %c0_i32, %c0_i32_0 : i32, i32
  }
  func.func @transform_6(%arg0: i32, %arg1: i32) -> (i32, i32) {
    %c0_i32 = arith.constant 0 : i32
    %c0_i32_0 = arith.constant 0 : i32
    %c0_i32_1 = arith.constant 0 : i32
    return %c0_i32, %c0_i32_0 : i32, i32
  }
  func.func @transform_7(%arg0: i32, %arg1: i32) -> (i32, i32, i32) {
    %c0_i32 = arith.constant 0 : i32
    %c0_i32_0 = arith.constant 0 : i32
    return %arg0, %c0_i32, %arg1 : i32, i32, i32
  }
}

module attributes {stable_mosaic.version = 11 : i64} {
  func.func @fcblock_kernel(%arg0: i32, %arg1: i32, %arg2: memref<1x4x16xf32, #tpu.memory_space<vmem>>, %arg3: memref<32x4xbf16, #tpu.memory_space<vmem>>, %arg4: memref<32x1xf32, #tpu.memory_space<vmem>>, %arg5: memref<4x32x32xbf16, #tpu.memory_space<vmem>>, %arg6: memref<4x32x1xf32, #tpu.memory_space<vmem>>, %arg7: memref<6x32xbf16, #tpu.memory_space<vmem>>, %arg8: memref<6x1xf32, #tpu.memory_space<vmem>>, %arg9: memref<1x6x16xf32, #tpu.memory_space<vmem>>) attributes {dimension_semantics = [#tpu.dimension_semantics<parallel>, #tpu.dimension_semantics<parallel>], iteration_bounds = array<i64: 2, 1>, scalar_prefetch = 0 : i64, scratch_operands = 0 : i64, tpu.core_type = #tpu.core_type<tc>, window_params = [{transform_indices = @transform_0, window_bounds = array<i64: 1, 4, 16>}, {pipeline_mode = #tpu.pipeline_mode<synchronous>, transform_indices = @transform_1, window_bounds = array<i64: 32, 4>}, {pipeline_mode = #tpu.pipeline_mode<synchronous>, transform_indices = @transform_2, window_bounds = array<i64: 32, 1>}, {pipeline_mode = #tpu.pipeline_mode<synchronous>, transform_indices = @transform_3, window_bounds = array<i64: 4, 32, 32>}, {pipeline_mode = #tpu.pipeline_mode<synchronous>, transform_indices = @transform_4, window_bounds = array<i64: 4, 32, 1>}, {pipeline_mode = #tpu.pipeline_mode<synchronous>, transform_indices = @transform_5, window_bounds = array<i64: 6, 32>}, {pipeline_mode = #tpu.pipeline_mode<synchronous>, transform_indices = @transform_6, window_bounds = array<i64: 6, 1>}, {transform_indices = @transform_7, window_bounds = array<i64: 1, 6, 16>}]} {
    %c0 = arith.constant 0 : index
    %c0_0 = arith.constant 0 : index
    %c0_1 = arith.constant 0 : index
    %0 = vector.load %arg2[%c0, %c0_0, %c0_1] : memref<1x4x16xf32, #tpu.memory_space<vmem>>, vector<1x4x16xf32>
    %1 = vector.shape_cast %0 : vector<1x4x16xf32> to vector<4x16xf32>
    %2 = arith.truncf %1 : vector<4x16xf32> to vector<4x16xbf16>
    %c0_2 = arith.constant 0 : index
    %c0_3 = arith.constant 0 : index
    %3 = vector.load %arg3[%c0_2, %c0_3] : memref<32x4xbf16, #tpu.memory_space<vmem>>, vector<32x4xbf16>
    %cst = arith.constant dense<0.000000e+00> : vector<32x16xf32>
    %4 = tpu.matmul %3, %2, %cst {dimension_numbers = #tpu.dot_dimension_numbers<[1], [0], [0], [1], [0, 0, 1, 1], [], []>} : vector<32x4xbf16>, vector<4x16xbf16>, vector<32x16xf32> -> vector<32x16xf32>
    %c0_4 = arith.constant 0 : index
    %c0_5 = arith.constant 0 : index
    %5 = vector.load %arg4[%c0_4, %c0_5] : memref<32x1xf32, #tpu.memory_space<vmem>>, vector<32x1xf32>
    %6 = vector.broadcast %5 : vector<32x1xf32> to vector<32x16xf32>
    %7 = arith.addf %4, %6 : vector<32x16xf32>
    %cst_6 = arith.constant 0.000000e+00 : f32
    %8 = vector.broadcast %cst_6 : f32 to vector<32x16xf32>
    %9 = arith.cmpf oge, %7, %8 : vector<32x16xf32>
    %cst_7 = arith.constant 2.000000e-01 : f32
    %10 = vector.broadcast %cst_7 : f32 to vector<32x16xf32>
    %11 = arith.mulf %10, %7 : vector<32x16xf32>
    %12 = arith.select %9, %7, %11 : vector<32x16xi1>, vector<32x16xf32>
    %c0_8 = arith.constant 0 : index
    %c0_9 = arith.constant 0 : index
    %c0_10 = arith.constant 0 : index
    %13 = vector.load %arg5[%c0_8, %c0_9, %c0_10] : memref<4x32x32xbf16, #tpu.memory_space<vmem>>, vector<1x32x32xbf16>
    %14 = vector.shape_cast %13 : vector<1x32x32xbf16> to vector<32x32xbf16>
    %15 = arith.truncf %12 : vector<32x16xf32> to vector<32x16xbf16>
    %cst_11 = arith.constant dense<0.000000e+00> : vector<32x16xf32>
    %16 = tpu.matmul %14, %15, %cst_11 {dimension_numbers = #tpu.dot_dimension_numbers<[1], [0], [0], [1], [0, 0, 1, 1], [], []>} : vector<32x32xbf16>, vector<32x16xbf16>, vector<32x16xf32> -> vector<32x16xf32>
    %c0_12 = arith.constant 0 : index
    %c0_13 = arith.constant 0 : index
    %c0_14 = arith.constant 0 : index
    %17 = vector.load %arg6[%c0_12, %c0_13, %c0_14] : memref<4x32x1xf32, #tpu.memory_space<vmem>>, vector<1x32x1xf32>
    %18 = vector.shape_cast %17 : vector<1x32x1xf32> to vector<32x1xf32>
    %19 = vector.broadcast %18 : vector<32x1xf32> to vector<32x16xf32>
    %20 = arith.addf %16, %19 : vector<32x16xf32>
    %cst_15 = arith.constant 0.000000e+00 : f32
    %21 = vector.broadcast %cst_15 : f32 to vector<32x16xf32>
    %22 = arith.cmpf oge, %20, %21 : vector<32x16xf32>
    %cst_16 = arith.constant 2.000000e-01 : f32
    %23 = vector.broadcast %cst_16 : f32 to vector<32x16xf32>
    %24 = arith.mulf %23, %20 : vector<32x16xf32>
    %25 = arith.select %22, %20, %24 : vector<32x16xi1>, vector<32x16xf32>
    %c1 = arith.constant 1 : index
    %c0_17 = arith.constant 0 : index
    %c0_18 = arith.constant 0 : index
    %26 = vector.load %arg5[%c1, %c0_17, %c0_18] : memref<4x32x32xbf16, #tpu.memory_space<vmem>>, vector<1x32x32xbf16>
    %27 = vector.shape_cast %26 : vector<1x32x32xbf16> to vector<32x32xbf16>
    %28 = arith.truncf %25 : vector<32x16xf32> to vector<32x16xbf16>
    %cst_19 = arith.constant dense<0.000000e+00> : vector<32x16xf32>
    %29 = tpu.matmul %27, %28, %cst_19 {dimension_numbers = #tpu.dot_dimension_numbers<[1], [0], [0], [1], [0, 0, 1, 1], [], []>} : vector<32x32xbf16>, vector<32x16xbf16>, vector<32x16xf32> -> vector<32x16xf32>
    %c1_20 = arith.constant 1 : index
    %c0_21 = arith.constant 0 : index
    %c0_22 = arith.constant 0 : index
    %30 = vector.load %arg6[%c1_20, %c0_21, %c0_22] : memref<4x32x1xf32, #tpu.memory_space<vmem>>, vector<1x32x1xf32>
    %31 = vector.shape_cast %30 : vector<1x32x1xf32> to vector<32x1xf32>
    %32 = vector.broadcast %31 : vector<32x1xf32> to vector<32x16xf32>
    %33 = arith.addf %29, %32 : vector<32x16xf32>
    %cst_23 = arith.constant 0.000000e+00 : f32
    %34 = vector.broadcast %cst_23 : f32 to vector<32x16xf32>
    %35 = arith.cmpf oge, %33, %34 : vector<32x16xf32>
    %cst_24 = arith.constant 2.000000e-01 : f32
    %36 = vector.broadcast %cst_24 : f32 to vector<32x16xf32>
    %37 = arith.mulf %36, %33 : vector<32x16xf32>
    %38 = arith.select %35, %33, %37 : vector<32x16xi1>, vector<32x16xf32>
    %39 = arith.addf %12, %38 : vector<32x16xf32>
    %c2 = arith.constant 2 : index
    %c0_25 = arith.constant 0 : index
    %c0_26 = arith.constant 0 : index
    %40 = vector.load %arg5[%c2, %c0_25, %c0_26] : memref<4x32x32xbf16, #tpu.memory_space<vmem>>, vector<1x32x32xbf16>
    %41 = vector.shape_cast %40 : vector<1x32x32xbf16> to vector<32x32xbf16>
    %42 = arith.truncf %39 : vector<32x16xf32> to vector<32x16xbf16>
    %cst_27 = arith.constant dense<0.000000e+00> : vector<32x16xf32>
    %43 = tpu.matmul %41, %42, %cst_27 {dimension_numbers = #tpu.dot_dimension_numbers<[1], [0], [0], [1], [0, 0, 1, 1], [], []>} : vector<32x32xbf16>, vector<32x16xbf16>, vector<32x16xf32> -> vector<32x16xf32>
    %c2_28 = arith.constant 2 : index
    %c0_29 = arith.constant 0 : index
    %c0_30 = arith.constant 0 : index
    %44 = vector.load %arg6[%c2_28, %c0_29, %c0_30] : memref<4x32x1xf32, #tpu.memory_space<vmem>>, vector<1x32x1xf32>
    %45 = vector.shape_cast %44 : vector<1x32x1xf32> to vector<32x1xf32>
    %46 = vector.broadcast %45 : vector<32x1xf32> to vector<32x16xf32>
    %47 = arith.addf %43, %46 : vector<32x16xf32>
    %cst_31 = arith.constant 0.000000e+00 : f32
    %48 = vector.broadcast %cst_31 : f32 to vector<32x16xf32>
    %49 = arith.cmpf oge, %47, %48 : vector<32x16xf32>
    %cst_32 = arith.constant 2.000000e-01 : f32
    %50 = vector.broadcast %cst_32 : f32 to vector<32x16xf32>
    %51 = arith.mulf %50, %47 : vector<32x16xf32>
    %52 = arith.select %49, %47, %51 : vector<32x16xi1>, vector<32x16xf32>
    %c3 = arith.constant 3 : index
    %c0_33 = arith.constant 0 : index
    %c0_34 = arith.constant 0 : index
    %53 = vector.load %arg5[%c3, %c0_33, %c0_34] : memref<4x32x32xbf16, #tpu.memory_space<vmem>>, vector<1x32x32xbf16>
    %54 = vector.shape_cast %53 : vector<1x32x32xbf16> to vector<32x32xbf16>
    %55 = arith.truncf %52 : vector<32x16xf32> to vector<32x16xbf16>
    %cst_35 = arith.constant dense<0.000000e+00> : vector<32x16xf32>
    %56 = tpu.matmul %54, %55, %cst_35 {dimension_numbers = #tpu.dot_dimension_numbers<[1], [0], [0], [1], [0, 0, 1, 1], [], []>} : vector<32x32xbf16>, vector<32x16xbf16>, vector<32x16xf32> -> vector<32x16xf32>
    %c3_36 = arith.constant 3 : index
    %c0_37 = arith.constant 0 : index
    %c0_38 = arith.constant 0 : index
    %57 = vector.load %arg6[%c3_36, %c0_37, %c0_38] : memref<4x32x1xf32, #tpu.memory_space<vmem>>, vector<1x32x1xf32>
    %58 = vector.shape_cast %57 : vector<1x32x1xf32> to vector<32x1xf32>
    %59 = vector.broadcast %58 : vector<32x1xf32> to vector<32x16xf32>
    %60 = arith.addf %56, %59 : vector<32x16xf32>
    %cst_39 = arith.constant 0.000000e+00 : f32
    %61 = vector.broadcast %cst_39 : f32 to vector<32x16xf32>
    %62 = arith.cmpf oge, %60, %61 : vector<32x16xf32>
    %cst_40 = arith.constant 2.000000e-01 : f32
    %63 = vector.broadcast %cst_40 : f32 to vector<32x16xf32>
    %64 = arith.mulf %63, %60 : vector<32x16xf32>
    %65 = arith.select %62, %60, %64 : vector<32x16xi1>, vector<32x16xf32>
    %66 = arith.addf %39, %65 : vector<32x16xf32>
    %c0_41 = arith.constant 0 : index
    %c0_42 = arith.constant 0 : index
    %67 = vector.load %arg7[%c0_41, %c0_42] : memref<6x32xbf16, #tpu.memory_space<vmem>>, vector<6x32xbf16>
    %68 = arith.truncf %66 : vector<32x16xf32> to vector<32x16xbf16>
    %cst_43 = arith.constant dense<0.000000e+00> : vector<6x16xf32>
    %69 = tpu.matmul %67, %68, %cst_43 {dimension_numbers = #tpu.dot_dimension_numbers<[1], [0], [0], [1], [0, 0, 1, 1], [], []>} : vector<6x32xbf16>, vector<32x16xbf16>, vector<6x16xf32> -> vector<6x16xf32>
    %c0_44 = arith.constant 0 : index
    %c0_45 = arith.constant 0 : index
    %70 = vector.load %arg8[%c0_44, %c0_45] : memref<6x1xf32, #tpu.memory_space<vmem>>, vector<6x1xf32>
    %71 = vector.broadcast %70 : vector<6x1xf32> to vector<6x16xf32>
    %72 = arith.addf %69, %71 : vector<6x16xf32>
    %c0_46 = arith.constant 0 : index
    %c0_47 = arith.constant 0 : index
    %c0_48 = arith.constant 0 : index
    %73 = vector.load %arg9[%c0_46, %c0_47, %c0_48] : memref<1x6x16xf32, #tpu.memory_space<vmem>>, vector<1x6x16xf32>
    %74 = vector.shape_cast %73 : vector<1x6x16xf32> to vector<6x16xf32>
    %75 = vector.shape_cast %72 : vector<6x16xf32> to vector<1x6x16xf32>
    tpu.vector_store %arg9[%c0_46, %c0_47, %c0_48], %75 {strides = array<i32>} : memref<1x6x16xf32, #tpu.memory_space<vmem>>, vector<1x6x16xf32>,
    return
  }
  func.func @transform_0(%arg0: i32, %arg1: i32) -> (i32, i32, i32) {
    %c0_i32 = arith.constant 0 : i32
    %c0_i32_0 = arith.constant 0 : i32
    return %arg0, %c0_i32, %arg1 : i32, i32, i32
  }
  func.func @transform_1(%arg0: i32, %arg1: i32) -> (i32, i32) {
    %c0_i32 = arith.constant 0 : i32
    %c0_i32_0 = arith.constant 0 : i32
    %c0_i32_1 = arith.constant 0 : i32
    return %c0_i32, %c0_i32_0 : i32, i32
  }
  func.func @transform_2(%arg0: i32, %arg1: i32) -> (i32, i32) {
    %c0_i32 = arith.constant 0 : i32
    %c0_i32_0 = arith.constant 0 : i32
    %c0_i32_1 = arith.constant 0 : i32
    return %c0_i32, %c0_i32_0 : i32, i32
  }
  func.func @transform_3(%arg0: i32, %arg1: i32) -> (i32, i32, i32) {
    %c0_i32 = arith.constant 0 : i32
    %c0_i32_0 = arith.constant 0 : i32
    %c0_i32_1 = arith.constant 0 : i32
    %c0_i32_2 = arith.constant 0 : i32
    return %c0_i32, %c0_i32_0, %c0_i32_1 : i32, i32, i32
  }
  func.func @transform_4(%arg0: i32, %arg1: i32) -> (i32, i32, i32) {
    %c0_i32 = arith.constant 0 : i32
    %c0_i32_0 = arith.constant 0 : i32
    %c0_i32_1 = arith.constant 0 : i32
    %c0_i32_2 = arith.constant 0 : i32
    return %c0_i32, %c0_i32_0, %c0_i32_1 : i32, i32, i32
  }
  func.func @transform_5(%arg0: i32, %arg1: i32) -> (i32, i32) {
    %c0_i32 = arith.constant 0 : i32
    %c0_i32_0 = arith.constant 0 : i32
    %c0_i32_1 = arith.constant 0 : i32
    return %c0_i32, %c0_i32_0 : i32, i32
  }
  func.func @transform_6(%arg0: i32, %arg1: i32) -> (i32, i32) {
    %c0_i32 = arith.constant 0 : i32
    %c0_i32_0 = arith.constant 0 : i32
    %c0_i32_1 = arith.constant 0 : i32
    return %c0_i32, %c0_i32_0 : i32, i32
  }
  func.func @transform_7(%arg0: i32, %arg1: i32) -> (i32, i32, i32) {
    %c0_i32 = arith.constant 0 : i32
    %c0_i32_0 = arith.constant 0 : i32
    return %arg0, %c0_i32, %arg1 : i32, i32, i32
  }
}

</mosaic_0001>

<bundles_post_ra>
// kernel: tpu_custom_call.1
= control target key start
LH: loop header
LB: loop body
LE: loop exit
PB: predicated region body
PF: predicated region fallthrough
CT: control target
= control target key end

     0   :  { %s1218_s24 = smov 0   ;;  %s1220_s25 = smov 0   ;;  %s1394_s0 = inlined_call_operand.vmem [shape: f32[2,4,16], index: 0, kind: input, shape index: {}]   ;;  %s1395_s1 = inlined_call_operand.vmem [shape: bf16[32,4], index: 1, kind: input, shape index: {}]   ;;  %s1396_s2 = inlined_call_operand.vmem [shape: f32[32,1], index: 2, kind: input, shape index: {}]   ;;  %s1397_s3 = inlined_call_operand.vmem [shape: bf16[4,32,32], index: 3, kind: input, shape index: {}]   ;;  %s1398_s4 = inlined_call_operand.vmem [shape: f32[4,32,1], index: 4, kind: input, shape index: {}]   ;;  %s1399_s5 = inlined_call_operand.vmem [shape: bf16[6,32], index: 5, kind: input, shape index: {}]   ;;  %s1400_s6 = inlined_call_operand.vmem [shape: f32[6,1], index: 6, kind: input, shape index: {}]   ;;  %s1401_s7 = inlined_call_operand.vmem [shape: f32[2,6,16], index: 7, kind: output, shape index: {}]  }
   0x1   :  { %s1222_s26 = smov 0  }
   0x2 LB: > { %s29_s27 = sadd.s32 1, %s1169_s25  ;;  %p993_p0 = scmp.ge.s32.totalorder %s1173_s26, 1  ;;  %s1173_s26 = sphi %s1222_s26, %s17_s26   ;;  %s1169_s25 = sphi %s1220_s25, %s1403_s25   ;;  %s1165_s24 = sphi %s1218_s24, %s1402_s24  }
   0x3   : > { %p31_p1 = scmp.ge.s32.totalorder %s29_s27, 2  ;;  %p255_p2 = scmp.lt.s32.totalorder %s1173_s26, 3 }
   0x5   : > { %s1405_s27 = smov (%p31_p1, %s29_s27), 0  ;;  %p256_p3 = pnand %p993_p0, %p255_p2 }
   0x6   : > { %p291_p4 = scmp.lt.s32.totalorder (!%p256_p3), %s1165_s24, 1 }
   0x7   : > { %259 = sbr.rel (%p256_p3) target bundleno = 1284 (0x504), region = 48 }
   0xc   : > { %v1141_v0 = vld [vmem:[%s1395_s1] sm:$0xff]   ;;  %vm346_vm0 = vcmask 31744   ;;  %s1407_s24 = smov (!%p291_p4, %s1165_s24), 1  ;;  %v314_v1 = vld [vmem:[%s1396_s2 + $0x10] sm:$0xff]  ;;  %v1175_v2 = vmov 0   ;;  %v315_v4 = vld [vmem:[%s1396_s2 + $0x18] sm:$0xff] }
   0xd   : > { %1067 = vmatprep.mubr.msk.bf16.mxu0 %vm346_vm0, %v1141_v0  ;;  %1139 = vset.pattern.permute.xlu0 %v1175_v2  ;;  %v312_v3 = vld [vmem:[%s1396_s2] sm:$0xff]  ;;  %s994_s11 = sshll.u32 %s1407_s24, 2  ;;  %vm353_vm1 = vcmask 1041408   ;;  %v313_v6 = vld [vmem:[%s1396_s2 + $0x8] sm:$0xff]  ;;  %v426_v10 = vld [vmem:[%s1398_s4 + $0x10] sm:$0xff]  ;;  %vm458_vm2 = vcmask 261120  }
   0xe   : > { %328 = vperm.xlu0 %1139, %v314_v1   ;;  %1140 = vset.pattern.permute.xlu1 %v1175_v2  ;;  %s297_s14 = scalar_lea.vmem %s1394_s0, %s994_s11  ;;  %v1142_v8 = vld [vmem:[%s1395_s1 + $0x8] sm:$0xff]   ;;  %v427_v11 = vld [vmem:[%s1398_s4 + $0x18] sm:$0xff]  ;;  %v424_v12 = vld [vmem:[%s1398_s4] sm:$0xff]  ;;  %s995_s16 = sshll.u32 %s1407_s24, 3 }
   0xf   : > { %318 = vperm.xlu1 %1140, %v312_v3   ;;  %v306_v5 = vld [vmem:[%s297_s14] sm:$0xf]  ;;  %v425_v13 = vld [vmem:[%s1398_s4 + $0x8] sm:$0xff]  ;;  %v1010_v14 = vld [vmem:[%s1398_s4 + $0x30] sm:$0xff]  ;;  %s304_s19 = scalar_lea.vmem %s1401_s7, %s995_s16 }
  0x10   : > { %v307_v7 = vpack.c.bf16 %v306_v5, %v306_v5  ;;  %v1011_v15 = vld [vmem:[%s1398_s4 + $0x38] sm:$0xff]  ;;  %v1008_v16 = vld [vmem:[%s1398_s4 + $0x20] sm:$0xff]  ;;  %v1009_v17 = vld [vmem:[%s1398_s4 + $0x28] sm:$0xff] }
  0x11   : > { %v1022_v18 = vld [vmem:[%s1398_s4 + $0x50] sm:$0xff]  ;;  %v1023_v19 = vld [vmem:[%s1398_s4 + $0x58] sm:$0xff]  ;;  %v1020_v20 = vld [vmem:[%s1398_s4 + $0x40] sm:$0xff] }
  0x12   : > { %333 = vperm.xlu0 %1139, %v315_v4   ;;  %1111 = vmatprep.subr.msk.bf16.mxu0 %vm353_vm1, %v307_v7  ;;  %v355_v9 = vsel %vm353_vm1, %v307_v7, 0  ;;  %v1021_v21 = vld [vmem:[%s1398_s4 + $0x48] sm:$0xff]  ;;  %v1034_v22 = vld [vmem:[%s1398_s4 + $0x70] sm:$0xff]  ;;  %v1035_v23 = vld [vmem:[%s1398_s4 + $0x78] sm:$0xff] }
  0x13   : > { %323 = vperm.xlu1 %1140, %v313_v6   ;;  %1066 = vmatpush3.bf16.msra.mxu0 %v355_v9  ;;  %v1032_v24 = vld [vmem:[%s1398_s4 + $0x60] sm:$0xff]  ;;  %v1033_v25 = vld [vmem:[%s1398_s4 + $0x68] sm:$0xff]  ;;  %v1145_v51 = vld [vmem:[%s1397_s3 + $0x10] sm:$0xff]  }
  0x14   : > { %v864_v26 = vld [vmem:[%s1400_s6] sm:$0x3f]  ;;  %v1144_v50 = vld [vmem:[%s1397_s3 + $0x8] sm:$0xff]  }
  0x15   : > { %v1143_v27 = vld [vmem:[%s1397_s3] sm:$0xff]  }
  0x16   : > { %440 = vperm.xlu0 %1139, %v426_v10   ;;  %1068 = vmatmul.mubr.msk.bf16.vlgmr.msra.gmra.mxu0 %vm346_vm0, %v1142_v8  ;;  %v1146_v10 = vld [vmem:[%s1397_s3 + $0x18] sm:$0xff]  }
  0x17   : > { %445 = vperm.xlu1 %1140, %v427_v11   ;;  %1075 = vmatprep.mubr.msk.bf16.mxu1 %vm458_vm2, %v1143_v27  ;;  %v1147_v11 = vld [vmem:[%s1397_s3 + $0x20] sm:$0xff]  }
  0x18   : > { %1083 = vmatprep.mubr.msk.bf16.mxu0 %vm458_vm2, %v1145_v51 }
  0x1a   : > { %430 = vperm.xlu0 %1139, %v424_v12  }
  0x1b   : > { %435 = vperm.xlu1 %1140, %v425_v13  }
  0x1e   : > { %550 = vperm.xlu0 %1139, %v1010_v14  }
  0x1f   : > { %555 = vperm.xlu1 %1140, %v1011_v15  }
  0x22   : > { %540 = vperm.xlu0 %1139, %v1008_v16  }
  0x23   : > { %545 = vperm.xlu1 %1140, %v1009_v17  }
  0x26   : > { %663 = vperm.xlu0 %1139, %v1022_v18  }
  0x27   : > { %668 = vperm.xlu1 %1140, %v1023_v19  }
  0x2a   : > { %653 = vperm.xlu0 %1139, %v1020_v20  }
  0x2b   : > { %658 = vperm.xlu1 %1140, %v1021_v21  }
  0x2e   : > { %772 = vperm.xlu0 %1139, %v1034_v22  }
  0x2f   : > { %777 = vperm.xlu1 %1140, %v1035_v23  }
  0x32   : > { %762 = vperm.xlu0 %1139, %v1032_v24  }
  0x33   : > { %767 = vperm.xlu1 %1140, %v1033_v25  }
  0x36   : > { %867 = vperm.xlu0 %1139, %v864_v26  }
  0x89   : > { %v329_v28 = vpop.permute.xlu0 %328 }
  0x8a   : > { %v319_v29 = vpop.permute.xlu1 %318 }
  0x8d   : > { %v334_v34 = vpop.permute.xlu0 %333 }
  0x8e   : > { %v324_v38 = vpop.permute.xlu1 %323 }
  0x91   : > { %v441_v52 = vpop.permute.xlu0 %440 }
  0x92   : > { %v446_v53 = vpop.permute.xlu1 %445 }
  0x95   : > { %v431_v56 = vpop.permute.xlu0 %430 }
  0x96   : > { %v436_v62 = vpop.permute.xlu1 %435 }
  0x99   : > { %v551_v12 = vpop.permute.xlu0 %550 }
  0x9a   : > { %v556_v13 = vpop.permute.xlu1 %555 }
  0x9d   : > { %v541_v16 = vpop.permute.xlu0 %540 }
  0x9e   : > { %v546_v23 = vpop.permute.xlu1 %545 }
  0xd6   : > { %v1069_v30 = vpop.f32.mrf.mxu0 }
  0xd7   : > { %v400_v31 = vadd.f32 %v1069_v30, %v329_v28 }
  0xd8   : > { %v391_v32 = vpop.f32.mrf.mxu0 }
  0xd9   : > { %v392_v33 = vadd.f32 %v391_v32, %v319_v29  ;;  %v412_v36 = vmul.f32 0.2, %v400_v31  ;;  %vm408_vm3 = vcmp.ge.f32.partialorder %v400_v31, 0.0 }
  0xda   : > { %v1070_v35 = vpop.f32.mrf.mxu0 }
  0xdb   : > { %v403_v37 = vadd.f32 %v1070_v35, %v334_v34  ;;  %v410_v40 = vmul.f32 0.2, %v392_v33  ;;  %vm406_vm5 = vcmp.ge.f32.partialorder %v392_v33, 0.0  ;;  %v1317_v44 = vsel %vm408_vm3, %v400_v31, %v412_v36 }
  0xdc   : > { %v394_v39 = vpop.f32.mrf.mxu0 }
  0xdd   : > { %v413_v41 = vmul.f32 0.2, %v403_v37  ;;  %v395_v42 = vadd.f32 %v394_v39, %v324_v38  ;;  %vm409_vm4 = vcmp.ge.f32.partialorder %v403_v37, 0.0  ;;  %v1323_v47 = vsel %vm406_vm5, %v392_v33, %v410_v40  ;;  %v1148_v38 = vld [vmem:[%s1397_s3 + $0x28] sm:$0xff]   ;;  %v1149_v39 = vld [vmem:[%s1397_s3 + $0x30] sm:$0xff]   ;;  %v664_v40 = vpop.permute.xlu0 %663 }
  0xdf   : > { %vm407_vm6 = vcmp.ge.f32.partialorder %v395_v42, 0.0  ;;  %v411_v43 = vmul.f32 0.2, %v395_v42  ;;  %v1319_v45 = vsel %vm409_vm4, %v403_v37, %v413_v41  ;;  %v669_v41 = vpop.permute.xlu1 %668  ;;  %vm1177_vm4 = vmmov 0  }
  0xe0   : > { %v423_v46 = vpack.c.bf16 %v1319_v45, %v1317_v44 }
  0xe1   : > { %v1325_v48 = vsel %vm407_vm6, %v395_v42, %v411_v43 }
  0xe2   : > { %1071 = vmatprep.subr.bf16.mxu1 %v423_v46  ;;  %v422_v49 = vpack.c.bf16 %v1325_v48, %v1323_v47 }
  0xe3   : > { %1072 = vmatpush3.bf16.msra.mxu1 %v423_v46 }
  0xe4   : > { %1073 = vmatprep.subr.bf16.mxu1 %v422_v49 }
  0xe7   : > { %1074 = vmatpush3.bf16.msra.mxu1 %v422_v49 }
  0xea   : > { %1076 = vmatmul.mubr.msk.bf16.vlgmr.msra.gmra.mxu1 %vm458_vm2, %v1144_v50  ;;  %v659_v50 = vpop.permute.xlu1 %658 }
  0xeb   : > { %1091 = vmatprep.mubr.msk.bf16.mxu1 %vm458_vm2, %v1147_v11 }
 0x1aa   : > { %v1077_v54 = vpop.f32.mrf.mxu1 }
 0x1ab   : > { %v508_v55 = vadd.f32 %v1077_v54, %v441_v52 }
 0x1ac   : > { %v499_v57 = vpop.f32.mrf.mxu1 }
 0x1ad   : > { %v500_v58 = vadd.f32 %v499_v57, %v431_v56  ;;  %v520_v60 = vmul.f32 0.2, %v508_v55  ;;  %vm516_vm7 = vcmp.ge.f32.partialorder %v508_v55, 0.0 }
 0x1ae   : > { %v1078_v59 = vpop.f32.mrf.mxu1 }
 0x1af   : > { %v511_v61 = vadd.f32 %v1078_v59, %v446_v53  ;;  %v518_v0 = vmul.f32 0.2, %v500_v58  ;;  %vm514_vm9 = vcmp.ge.f32.partialorder %v500_v58, 0.0  ;;  %v524_v4 = vsel %vm516_vm7, %v508_v55, %v520_v60 }
 0x1b0   : > { %v502_v63 = vpop.f32.mrf.mxu1 }
 0x1b1   : > { %vm517_vm8 = vcmp.ge.f32.partialorder %v511_v61, 0.0  ;;  %v521_v1 = vmul.f32 0.2, %v511_v61  ;;  %v503_v2 = vadd.f32 %v502_v63, %v436_v62  ;;  %v522_v7 = vsel %vm514_vm9, %v500_v58, %v518_v0  ;;  %v1150_v62 = vld [vmem:[%s1397_s3 + $0x38] sm:$0xff]  }
 0x1b2   : > { %v1176_v63 = vmov 0.0   ;;  %vm913_vm9 = vcmask 128000  }
 0x1b3   : > { %vm515_vm10 = vcmp.ge.f32.partialorder %v503_v2, 0.0  ;;  %v519_v3 = vmul.f32 0.2, %v503_v2  ;;  %v525_v5 = vsel %vm517_vm8, %v511_v61, %v521_v1  ;;  %v778_v1 = vpop.permute.xlu1 %777 }
 0x1b4   : > { %v532_v6 = vpack.c.bf16 %v525_v5, %v524_v4 }
 0x1b5   : > { %v523_v8 = vsel %vm515_vm10, %v503_v2, %v519_v3 }
 0x1b6   : > { %1079 = vmatprep.subr.bf16.mxu0 %v532_v6  ;;  %v531_v9 = vpack.c.bf16 %v523_v8, %v522_v7 }
 0x1b7   : > { %1080 = vmatpush3.bf16.msra.mxu0 %v532_v6 }
 0x1b8   : > { %1081 = vmatprep.subr.bf16.mxu0 %v531_v9 }
 0x1bb   : > { %1082 = vmatpush3.bf16.msra.mxu0 %v531_v9 }
 0x1be   : > { %1084 = vmatmul.mubr.msk.bf16.vlgmr.msra.gmra.mxu0 %vm458_vm2, %v1146_v10  ;;  %v768_v10 = vpop.permute.xlu1 %767 }
 0x1bf   : > { %1099 = vmatprep.mubr.msk.bf16.mxu0 %vm458_vm2, %v1149_v39 }
 0x27e   : > { %v1085_v14 = vpop.f32.mrf.mxu0 }
 0x27f   : > { %v617_v15 = vadd.f32 %v1085_v14, %v551_v12 }
 0x280   : > { %v608_v17 = vpop.f32.mrf.mxu0 }
 0x281   : > { %v629_v18 = vmul.f32 0.2, %v617_v15  ;;  %v609_v19 = vadd.f32 %v608_v17, %v541_v16  ;;  %vm625_vm11 = vcmp.ge.f32.partialorder %v617_v15, 0.0 }
 0x282   : > { %v1086_v20 = vpop.f32.mrf.mxu0 }
 0x283   : > { %v627_v21 = vmul.f32 0.2, %v609_v19  ;;  %v620_v22 = vadd.f32 %v1086_v20, %v556_v13  ;;  %vm623_vm12 = vcmp.ge.f32.partialorder %v609_v19, 0.0  ;;  %v633_v25 = vsel %vm625_vm11, %v617_v15, %v629_v18 }
 0x284   : > { %v611_v24 = vpop.f32.mrf.mxu0  ;;  %v1346_v31 = vadd.f32 %v633_v25, %v1317_v44  ;;  %v654_v44 = vpop.permute.xlu0 %653 }
 0x285   : > { %vm626_vm13 = vcmp.ge.f32.partialorder %v620_v22, 0.0  ;;  %v630_v26 = vmul.f32 0.2, %v620_v22  ;;  %v612_v27 = vadd.f32 %v611_v24, %v546_v23  ;;  %v631_v28 = vsel %vm623_vm12, %v609_v19, %v627_v21 }
 0x286   : > { %v1354_v35 = vadd.f32 %v631_v28, %v1323_v47 }
 0x287   : > { %v634_v29 = vsel %vm626_vm13, %v620_v22, %v630_v26  ;;  %vm624_vm14 = vcmp.ge.f32.partialorder %v612_v27, 0.0  ;;  %v628_v30 = vmul.f32 0.2, %v612_v27  ;;  %v861_v26 = vld [vmem:[%s1399_s5] sm:$0x7] }
 0x288   : > { %v1349_v32 = vadd.f32 %v634_v29, %v1319_v45  ;;  %v773_v0 = vpop.permute.xlu0 %772 }
 0x289   : > { %v632_v33 = vsel %vm624_vm14, %v612_v27, %v628_v30 }
 0x28a   : > { %v645_v34 = vpack.c.bf16 %v1349_v32, %v1346_v31  ;;  %v1357_v36 = vadd.f32 %v632_v33, %v1325_v48 }
 0x28c   : > { %1087 = vmatprep.subr.bf16.mxu1 %v645_v34  ;;  %v644_v37 = vpack.c.bf16 %v1357_v36, %v1354_v35  ;;  %v763_v4 = vpop.permute.xlu0 %762 }
 0x28d   : > { %1088 = vmatpush3.bf16.msra.mxu1 %v645_v34 }
 0x28e   : > { %1089 = vmatprep.subr.bf16.mxu1 %v644_v37 }
 0x290   : > { %v868_v27 = vpop.permute.xlu0 %867 }
 0x291   : > { %1090 = vmatpush3.bf16.msra.mxu1 %v644_v37 }
 0x292   : > { %1103 = vmatprep.subr.bf16.mxu1 %v1176_v63 }
 0x294   : > { %1092 = vmatmul.mubr.msk.bf16.vlgmr.msra.gmra.mxu1 %vm458_vm2, %v1148_v38 }
 0x295   : > { %1107 = vmatprep.mubr.msk.bf16.mxu1 %vm1177_vm4, %v1176_v63 }
 0x354   : > { %v1093_v42 = vpop.f32.mrf.mxu1 }
 0x355   : > { %v730_v43 = vadd.f32 %v1093_v42, %v664_v40 }
 0x356   : > { %v721_v45 = vpop.f32.mrf.mxu1 }
 0x357   : > { %v722_v46 = vadd.f32 %v721_v45, %v654_v44  ;;  %v742_v48 = vmul.f32 0.2, %v730_v43  ;;  %vm738_vm15 = vcmp.ge.f32.partialorder %v730_v43, 0.0 }
 0x358   : > { %v1094_v47 = vpop.f32.mrf.mxu1 }
 0x359   : > { %v733_v49 = vadd.f32 %v1094_v47, %v669_v41  ;;  %v740_v52 = vmul.f32 0.2, %v722_v46  ;;  %vm736_vm1 = vcmp.ge.f32.partialorder %v722_v46, 0.0  ;;  %v746_v56 = vsel %vm738_vm15, %v730_v43, %v742_v48 }
 0x35a   : > { %v724_v51 = vpop.f32.mrf.mxu1 }
 0x35b   : > { %vm739_vm0 = vcmp.ge.f32.partialorder %v733_v49, 0.0  ;;  %v743_v53 = vmul.f32 0.2, %v733_v49  ;;  %v725_v54 = vadd.f32 %v724_v51, %v659_v50  ;;  %v744_v59 = vsel %vm736_vm1, %v722_v46, %v740_v52 }
 0x35d   : > { %vm737_vm3 = vcmp.ge.f32.partialorder %v725_v54, 0.0  ;;  %v741_v55 = vmul.f32 0.2, %v725_v54  ;;  %v747_v57 = vsel %vm739_vm0, %v733_v49, %v743_v53 }
 0x35e   : > { %v754_v58 = vpack.c.bf16 %v747_v57, %v746_v56 }
 0x35f   : > { %v745_v60 = vsel %vm737_vm3, %v725_v54, %v741_v55 }
 0x360   : > { %1095 = vmatprep.subr.bf16.mxu0 %v754_v58  ;;  %v753_v61 = vpack.c.bf16 %v745_v60, %v744_v59 }
 0x361   : > { %1096 = vmatpush3.bf16.msra.mxu0 %v754_v58 }
 0x362   : > { %1097 = vmatprep.subr.bf16.mxu0 %v753_v61 }
 0x365   : > { %1098 = vmatpush3.bf16.msra.mxu0 %v753_v61 }
 0x368   : > { %1100 = vmatmul.mubr.msk.bf16.vlgmr.msra.gmra.mxu0 %vm458_vm2, %v1150_v62 }
 0x428   : > { %v1101_v2 = vpop.f32.mrf.mxu0 }
 0x429   : > { %v839_v3 = vadd.f32 %v1101_v2, %v773_v0 }
 0x42a   : > { %v830_v5 = vpop.f32.mrf.mxu0 }
 0x42b   : > { %vm847_vm5 = vcmp.ge.f32.partialorder %v839_v3, 0.0  ;;  %v851_v6 = vmul.f32 0.2, %v839_v3  ;;  %v831_v7 = vadd.f32 %v830_v5, %v763_v4 }
 0x42c   : > { %v1102_v8 = vpop.f32.mrf.mxu0 }
 0x42d   : > { %v842_v9 = vadd.f32 %v1102_v8, %v778_v1  ;;  %v855_v11 = vsel %vm847_vm5, %v839_v3, %v851_v6  ;;  %v849_v13 = vmul.f32 0.2, %v831_v7  ;;  %vm845_vm7 = vcmp.ge.f32.partialorder %v831_v7, 0.0 }
 0x42e   : > { %v833_v12 = vpop.f32.mrf.mxu0  ;;  %v859_v18 = vadd.f32 %v855_v11, %v1346_v31 }
 0x42f   : > { %vm848_vm6 = vcmp.ge.f32.partialorder %v842_v9, 0.0  ;;  %v852_v14 = vmul.f32 0.2, %v842_v9  ;;  %v834_v15 = vadd.f32 %v833_v12, %v768_v10  ;;  %v853_v20 = vsel %vm845_vm7, %v831_v7, %v849_v13 }
 0x430   : > { %v857_v24 = vadd.f32 %v853_v20, %v1354_v35 }
 0x431   : > { %v856_v16 = vsel %vm848_vm6, %v842_v9, %v852_v14  ;;  %vm846_vm8 = vcmp.ge.f32.partialorder %v834_v15, 0.0  ;;  %v850_v17 = vmul.f32 0.2, %v834_v15 }
 0x432   : > { %v860_v19 = vadd.f32 %v856_v16, %v1349_v32 }
 0x433   : > { %v854_v21 = vsel %vm846_vm8, %v834_v15, %v850_v17 }
 0x434   : > { %v858_v22 = vadd.f32 %v854_v21, %v1357_v36  ;;  %v863_v23 = vpack.c.bf16 %v860_v19, %v859_v18 }
 0x436   : > { %1104 = vmatpush3.bf16.msra.mxu1 %v863_v23  ;;  %v862_v25 = vpack.c.bf16 %v858_v22, %v857_v24 }
 0x437   : > { %1105 = vmatprep.subr.bf16.mxu1 %v1176_v63 }
 0x43a   : > { %1106 = vmatpush3.bf16.msra.mxu1 %v862_v25 }
 0x43d   : > { %1108 = vmatmul.mubr.msk.bf16.vlgmr.msra.gmra.mxu1 %vm458_vm2, %v861_v26 }
 0x4fd   : > { %v907_v28 = vpop.f32.mrf.mxu1 }
 0x4fe   : > { %v908_v29 = vadd.f32 %v907_v28, %v868_v27 }
 0x4ff   : > { %v1109_v30 = vpop.f32.mrf.mxu1 }
 0x500   : > { %914 = vst.msk [vmem:[%s304_s19] sm:$0x3f] %vm913_vm9, %v908_v29 }
 0x501   : > { %v910_v31 = vpop.f32.mrf.mxu1 }
 0x503   : > { %v1110_v32 = vpop.f32.mrf.mxu1 }
 0x504 PF: > { %s17_s26 = sadd.s32 1, %s1173_s26   ;;  %s1402_s24 = smov %s1169_s25 }
 0x505   : > { %p14_p5 = scmp.ge.s32.totalorder %s17_s26, 4   ;;  %s1403_s25 = smov %s1405_s27 }
 0x507   :  { %16 = sbr.rel (!%p14_p5) target bundleno = 2 (0x2), region = 84 }

// kernel: tpu_custom_call.1
= control target key start
LH: loop header
LB: loop body
LE: loop exit
PB: predicated region body
PF: predicated region fallthrough
CT: control target
= control target key end

     0   :  { %s1218_s24 = smov 0   ;;  %s1220_s25 = smov 0   ;;  %s1394_s0 = inlined_call_operand.vmem [shape: f32[2,4,16], index: 0, kind: input, shape index: {}]   ;;  %s1395_s1 = inlined_call_operand.vmem [shape: bf16[32,4], index: 1, kind: input, shape index: {}]   ;;  %s1396_s2 = inlined_call_operand.vmem [shape: f32[32,1], index: 2, kind: input, shape index: {}]   ;;  %s1397_s3 = inlined_call_operand.vmem [shape: bf16[4,32,32], index: 3, kind: input, shape index: {}]   ;;  %s1398_s4 = inlined_call_operand.vmem [shape: f32[4,32,1], index: 4, kind: input, shape index: {}]   ;;  %s1399_s5 = inlined_call_operand.vmem [shape: bf16[6,32], index: 5, kind: input, shape index: {}]   ;;  %s1400_s6 = inlined_call_operand.vmem [shape: f32[6,1], index: 6, kind: input, shape index: {}]   ;;  %s1401_s7 = inlined_call_operand.vmem [shape: f32[2,6,16], index: 7, kind: output, shape index: {}]  }
   0x1   :  { %s1222_s26 = smov 0  }
   0x2 LB: > { %s29_s27 = sadd.s32 1, %s1169_s25  ;;  %p993_p0 = scmp.ge.s32.totalorder %s1173_s26, 1  ;;  %s1173_s26 = sphi %s1222_s26, %s17_s26   ;;  %s1169_s25 = sphi %s1220_s25, %s1403_s25   ;;  %s1165_s24 = sphi %s1218_s24, %s1402_s24  }
   0x3   : > { %p31_p1 = scmp.ge.s32.totalorder %s29_s27, 2  ;;  %p255_p2 = scmp.lt.s32.totalorder %s1173_s26, 3 }
   0x5   : > { %s1405_s27 = smov (%p31_p1, %s29_s27), 0  ;;  %p256_p3 = pnand %p993_p0, %p255_p2 }
   0x6   : > { %p291_p4 = scmp.lt.s32.totalorder (!%p256_p3), %s1165_s24, 1 }
   0x7   : > { %259 = sbr.rel (%p256_p3) target bundleno = 1284 (0x504), region = 48 }
   0xc   : > { %v1141_v0 = vld [vmem:[%s1395_s1] sm:$0xff]   ;;  %vm346_vm0 = vcmask 31744   ;;  %s1407_s24 = smov (!%p291_p4, %s1165_s24), 1  ;;  %v314_v1 = vld [vmem:[%s1396_s2 + $0x10] sm:$0xff]  ;;  %v1175_v2 = vmov 0   ;;  %v315_v4 = vld [vmem:[%s1396_s2 + $0x18] sm:$0xff] }
   0xd   : > { %1067 = vmatprep.mubr.msk.bf16.mxu0 %vm346_vm0, %v1141_v0  ;;  %1139 = vset.pattern.permute.xlu0 %v1175_v2  ;;  %v312_v3 = vld [vmem:[%s1396_s2] sm:$0xff]  ;;  %s994_s11 = sshll.u32 %s1407_s24, 2  ;;  %vm353_vm1 = vcmask 1041408   ;;  %v313_v6 = vld [vmem:[%s1396_s2 + $0x8] sm:$0xff]  ;;  %v426_v10 = vld [vmem:[%s1398_s4 + $0x10] sm:$0xff]  ;;  %vm458_vm2 = vcmask 261120  }
   0xe   : > { %328 = vperm.xlu0 %1139, %v314_v1   ;;  %1140 = vset.pattern.permute.xlu1 %v1175_v2  ;;  %s297_s14 = scalar_lea.vmem %s1394_s0, %s994_s11  ;;  %v1142_v8 = vld [vmem:[%s1395_s1 + $0x8] sm:$0xff]   ;;  %v427_v11 = vld [vmem:[%s1398_s4 + $0x18] sm:$0xff]  ;;  %v424_v12 = vld [vmem:[%s1398_s4] sm:$0xff]  ;;  %s995_s16 = sshll.u32 %s1407_s24, 3 }
   0xf   : > { %318 = vperm.xlu1 %1140, %v312_v3   ;;  %v306_v5 = vld [vmem:[%s297_s14] sm:$0xf]  ;;  %v425_v13 = vld [vmem:[%s1398_s4 + $0x8] sm:$0xff]  ;;  %v1010_v14 = vld [vmem:[%s1398_s4 + $0x30] sm:$0xff]  ;;  %s304_s19 = scalar_lea.vmem %s1401_s7, %s995_s16 }
  0x10   : > { %v307_v7 = vpack.c.bf16 %v306_v5, %v306_v5  ;;  %v1011_v15 = vld [vmem:[%s1398_s4 + $0x38] sm:$0xff]  ;;  %v1008_v16 = vld [vmem:[%s1398_s4 + $0x20] sm:$0xff]  ;;  %v1009_v17 = vld [vmem:[%s1398_s4 + $0x28] sm:$0xff] }
  0x11   : > { %v1022_v18 = vld [vmem:[%s1398_s4 + $0x50] sm:$0xff]  ;;  %v1023_v19 = vld [vmem:[%s1398_s4 + $0x58] sm:$0xff]  ;;  %v1020_v20 = vld [vmem:[%s1398_s4 + $0x40] sm:$0xff] }
  0x12   : > { %333 = vperm.xlu0 %1139, %v315_v4   ;;  %1111 = vmatprep.subr.msk.bf16.mxu0 %vm353_vm1, %v307_v7  ;;  %v355_v9 = vsel %vm353_vm1, %v307_v7, 0  ;;  %v1021_v21 = vld [vmem:[%s1398_s4 + $0x48] sm:$0xff]  ;;  %v1034_v22 = vld [vmem:[%s1398_s4 + $0x70] sm:$0xff]  ;;  %v1035_v23 = vld [vmem:[%s1398_s4 + $0x78] sm:$0xff] }
  0x13   : > { %323 = vperm.xlu1 %1140, %v313_v6   ;;  %1066 = vmatpush3.bf16.msra.mxu0 %v355_v9  ;;  %v1032_v24 = vld [vmem:[%s1398_s4 + $0x60] sm:$0xff]  ;;  %v1033_v25 = vld [vmem:[%s1398_s4 + $0x68] sm:$0xff]  ;;  %v1145_v51 = vld [vmem:[%s1397_s3 + $0x10] sm:$0xff]  }
  0x14   : > { %v864_v26 = vld [vmem:[%s1400_s6] sm:$0x3f]  ;;  %v1144_v50 = vld [vmem:[%s1397_s3 + $0x8] sm:$0xff]  }
  0x15   : > { %v1143_v27 = vld [vmem:[%s1397_s3] sm:$0xff]  }
  0x16   : > { %440 = vperm.xlu0 %1139, %v426_v10   ;;  %1068 = vmatmul.mubr.msk.bf16.vlgmr.msra.gmra.mxu0 %vm346_vm0, %v1142_v8  ;;  %v1146_v10 = vld [vmem:[%s1397_s3 + $0x18] sm:$0xff]  }
  0x17   : > { %445 = vperm.xlu1 %1140, %v427_v11   ;;  %1075 = vmatprep.mubr.msk.bf16.mxu1 %vm458_vm2, %v1143_v27  ;;  %v1147_v11 = vld [vmem:[%s1397_s3 + $0x20] sm:$0xff]  }
  0x18   : > { %1083 = vmatprep.mubr.msk.bf16.mxu0 %vm458_vm2, %v1145_v51 }
  0x1a   : > { %430 = vperm.xlu0 %1139, %v424_v12  }
  0x1b   : > { %435 = vperm.xlu1 %1140, %v425_v13  }
  0x1e   : > { %550 = vperm.xlu0 %1139, %v1010_v14  }
  0x1f   : > { %555 = vperm.xlu1 %1140, %v1011_v15  }
  0x22   : > { %540 = vperm.xlu0 %1139, %v1008_v16  }
  0x23   : > { %545 = vperm.xlu1 %1140, %v1009_v17  }
  0x26   : > { %663 = vperm.xlu0 %1139, %v1022_v18  }
  0x27   : > { %668 = vperm.xlu1 %1140, %v1023_v19  }
  0x2a   : > { %653 = vperm.xlu0 %1139, %v1020_v20  }
  0x2b   : > { %658 = vperm.xlu1 %1140, %v1021_v21  }
  0x2e   : > { %772 = vperm.xlu0 %1139, %v1034_v22  }
  0x2f   : > { %777 = vperm.xlu1 %1140, %v1035_v23  }
  0x32   : > { %762 = vperm.xlu0 %1139, %v1032_v24  }
  0x33   : > { %767 = vperm.xlu1 %1140, %v1033_v25  }
  0x36   : > { %867 = vperm.xlu0 %1139, %v864_v26  }
  0x89   : > { %v329_v28 = vpop.permute.xlu0 %328 }
  0x8a   : > { %v319_v29 = vpop.permute.xlu1 %318 }
  0x8d   : > { %v334_v34 = vpop.permute.xlu0 %333 }
  0x8e   : > { %v324_v38 = vpop.permute.xlu1 %323 }
  0x91   : > { %v441_v52 = vpop.permute.xlu0 %440 }
  0x92   : > { %v446_v53 = vpop.permute.xlu1 %445 }
  0x95   : > { %v431_v56 = vpop.permute.xlu0 %430 }
  0x96   : > { %v436_v62 = vpop.permute.xlu1 %435 }
  0x99   : > { %v551_v12 = vpop.permute.xlu0 %550 }
  0x9a   : > { %v556_v13 = vpop.permute.xlu1 %555 }
  0x9d   : > { %v541_v16 = vpop.permute.xlu0 %540 }
  0x9e   : > { %v546_v23 = vpop.permute.xlu1 %545 }
  0xd6   : > { %v1069_v30 = vpop.f32.mrf.mxu0 }
  0xd7   : > { %v400_v31 = vadd.f32 %v1069_v30, %v329_v28 }
  0xd8   : > { %v391_v32 = vpop.f32.mrf.mxu0 }
  0xd9   : > { %v392_v33 = vadd.f32 %v391_v32, %v319_v29  ;;  %v412_v36 = vmul.f32 0.2, %v400_v31  ;;  %vm408_vm3 = vcmp.ge.f32.partialorder %v400_v31, 0.0 }
  0xda   : > { %v1070_v35 = vpop.f32.mrf.mxu0 }
  0xdb   : > { %v403_v37 = vadd.f32 %v1070_v35, %v334_v34  ;;  %v410_v40 = vmul.f32 0.2, %v392_v33  ;;  %vm406_vm5 = vcmp.ge.f32.partialorder %v392_v33, 0.0  ;;  %v1317_v44 = vsel %vm408_vm3, %v400_v31, %v412_v36 }
  0xdc   : > { %v394_v39 = vpop.f32.mrf.mxu0 }
  0xdd   : > { %v413_v41 = vmul.f32 0.2, %v403_v37  ;;  %v395_v42 = vadd.f32 %v394_v39, %v324_v38  ;;  %vm409_vm4 = vcmp.ge.f32.partialorder %v403_v37, 0.0  ;;  %v1323_v47 = vsel %vm406_vm5, %v392_v33, %v410_v40  ;;  %v1148_v38 = vld [vmem:[%s1397_s3 + $0x28] sm:$0xff]   ;;  %v1149_v39 = vld [vmem:[%s1397_s3 + $0x30] sm:$0xff]   ;;  %v664_v40 = vpop.permute.xlu0 %663 }
  0xdf   : > { %vm407_vm6 = vcmp.ge.f32.partialorder %v395_v42, 0.0  ;;  %v411_v43 = vmul.f32 0.2, %v395_v42  ;;  %v1319_v45 = vsel %vm409_vm4, %v403_v37, %v413_v41  ;;  %v669_v41 = vpop.permute.xlu1 %668  ;;  %vm1177_vm4 = vmmov 0  }
  0xe0   : > { %v423_v46 = vpack.c.bf16 %v1319_v45, %v1317_v44 }
  0xe1   : > { %v1325_v48 = vsel %vm407_vm6, %v395_v42, %v411_v43 }
  0xe2   : > { %1071 = vmatprep.subr.bf16.mxu1 %v423_v46  ;;  %v422_v49 = vpack.c.bf16 %v1325_v48, %v1323_v47 }
  0xe3   : > { %1072 = vmatpush3.bf16.msra.mxu1 %v423_v46 }
  0xe4   : > { %1073 = vmatprep.subr.bf16.mxu1 %v422_v49 }
  0xe7   : > { %1074 = vmatpush3.bf16.msra.mxu1 %v422_v49 }
  0xea   : > { %1076 = vmatmul.mubr.msk.bf16.vlgmr.msra.gmra.mxu1 %vm458_vm2, %v1144_v50  ;;  %v659_v50 = vpop.permute.xlu1 %658 }
  0xeb   : > { %1091 = vmatprep.mubr.msk.bf16.mxu1 %vm458_vm2, %v1147_v11 }
 0x1aa   : > { %v1077_v54 = vpop.f32.mrf.mxu1 }
 0x1ab   : > { %v508_v55 = vadd.f32 %v1077_v54, %v441_v52 }
 0x1ac   : > { %v499_v57 = vpop.f32.mrf.mxu1 }
 0x1ad   : > { %v500_v58 = vadd.f32 %v499_v57, %v431_v56  ;;  %v520_v60 = vmul.f32 0.2, %v508_v55  ;;  %vm516_vm7 = vcmp.ge.f32.partialorder %v508_v55, 0.0 }
 0x1ae   : > { %v1078_v59 = vpop.f32.mrf.mxu1 }
 0x1af   : > { %v511_v61 = vadd.f32 %v1078_v59, %v446_v53  ;;  %v518_v0 = vmul.f32 0.2, %v500_v58  ;;  %vm514_vm9 = vcmp.ge.f32.partialorder %v500_v58, 0.0  ;;  %v524_v4 = vsel %vm516_vm7, %v508_v55, %v520_v60 }
 0x1b0   : > { %v502_v63 = vpop.f32.mrf.mxu1 }
 0x1b1   : > { %vm517_vm8 = vcmp.ge.f32.partialorder %v511_v61, 0.0  ;;  %v521_v1 = vmul.f32 0.2, %v511_v61  ;;  %v503_v2 = vadd.f32 %v502_v63, %v436_v62  ;;  %v522_v7 = vsel %vm514_vm9, %v500_v58, %v518_v0  ;;  %v1150_v62 = vld [vmem:[%s1397_s3 + $0x38] sm:$0xff]  }
 0x1b2   : > { %v1176_v63 = vmov 0.0   ;;  %vm913_vm9 = vcmask 128000  }
 0x1b3   : > { %vm515_vm10 = vcmp.ge.f32.partialorder %v503_v2, 0.0  ;;  %v519_v3 = vmul.f32 0.2, %v503_v2  ;;  %v525_v5 = vsel %vm517_vm8, %v511_v61, %v521_v1  ;;  %v778_v1 = vpop.permute.xlu1 %777 }
 0x1b4   : > { %v532_v6 = vpack.c.bf16 %v525_v5, %v524_v4 }
 0x1b5   : > { %v523_v8 = vsel %vm515_vm10, %v503_v2, %v519_v3 }
 0x1b6   : > { %1079 = vmatprep.subr.bf16.mxu0 %v532_v6  ;;  %v531_v9 = vpack.c.bf16 %v523_v8, %v522_v7 }
 0x1b7   : > { %1080 = vmatpush3.bf16.msra.mxu0 %v532_v6 }
 0x1b8   : > { %1081 = vmatprep.subr.bf16.mxu0 %v531_v9 }
 0x1bb   : > { %1082 = vmatpush3.bf16.msra.mxu0 %v531_v9 }
 0x1be   : > { %1084 = vmatmul.mubr.msk.bf16.vlgmr.msra.gmra.mxu0 %vm458_vm2, %v1146_v10  ;;  %v768_v10 = vpop.permute.xlu1 %767 }
 0x1bf   : > { %1099 = vmatprep.mubr.msk.bf16.mxu0 %vm458_vm2, %v1149_v39 }
 0x27e   : > { %v1085_v14 = vpop.f32.mrf.mxu0 }
 0x27f   : > { %v617_v15 = vadd.f32 %v1085_v14, %v551_v12 }
 0x280   : > { %v608_v17 = vpop.f32.mrf.mxu0 }
 0x281   : > { %v629_v18 = vmul.f32 0.2, %v617_v15  ;;  %v609_v19 = vadd.f32 %v608_v17, %v541_v16  ;;  %vm625_vm11 = vcmp.ge.f32.partialorder %v617_v15, 0.0 }
 0x282   : > { %v1086_v20 = vpop.f32.mrf.mxu0 }
 0x283   : > { %v627_v21 = vmul.f32 0.2, %v609_v19  ;;  %v620_v22 = vadd.f32 %v1086_v20, %v556_v13  ;;  %vm623_vm12 = vcmp.ge.f32.partialorder %v609_v19, 0.0  ;;  %v633_v25 = vsel %vm625_vm11, %v617_v15, %v629_v18 }
 0x284   : > { %v611_v24 = vpop.f32.mrf.mxu0  ;;  %v1346_v31 = vadd.f32 %v633_v25, %v1317_v44  ;;  %v654_v44 = vpop.permute.xlu0 %653 }
 0x285   : > { %vm626_vm13 = vcmp.ge.f32.partialorder %v620_v22, 0.0  ;;  %v630_v26 = vmul.f32 0.2, %v620_v22  ;;  %v612_v27 = vadd.f32 %v611_v24, %v546_v23  ;;  %v631_v28 = vsel %vm623_vm12, %v609_v19, %v627_v21 }
 0x286   : > { %v1354_v35 = vadd.f32 %v631_v28, %v1323_v47 }
 0x287   : > { %v634_v29 = vsel %vm626_vm13, %v620_v22, %v630_v26  ;;  %vm624_vm14 = vcmp.ge.f32.partialorder %v612_v27, 0.0  ;;  %v628_v30 = vmul.f32 0.2, %v612_v27  ;;  %v861_v26 = vld [vmem:[%s1399_s5] sm:$0x7] }
 0x288   : > { %v1349_v32 = vadd.f32 %v634_v29, %v1319_v45  ;;  %v773_v0 = vpop.permute.xlu0 %772 }
 0x289   : > { %v632_v33 = vsel %vm624_vm14, %v612_v27, %v628_v30 }
 0x28a   : > { %v645_v34 = vpack.c.bf16 %v1349_v32, %v1346_v31  ;;  %v1357_v36 = vadd.f32 %v632_v33, %v1325_v48 }
 0x28c   : > { %1087 = vmatprep.subr.bf16.mxu1 %v645_v34  ;;  %v644_v37 = vpack.c.bf16 %v1357_v36, %v1354_v35  ;;  %v763_v4 = vpop.permute.xlu0 %762 }
 0x28d   : > { %1088 = vmatpush3.bf16.msra.mxu1 %v645_v34 }
 0x28e   : > { %1089 = vmatprep.subr.bf16.mxu1 %v644_v37 }
 0x290   : > { %v868_v27 = vpop.permute.xlu0 %867 }
 0x291   : > { %1090 = vmatpush3.bf16.msra.mxu1 %v644_v37 }
 0x292   : > { %1103 = vmatprep.subr.bf16.mxu1 %v1176_v63 }
 0x294   : > { %1092 = vmatmul.mubr.msk.bf16.vlgmr.msra.gmra.mxu1 %vm458_vm2, %v1148_v38 }
 0x295   : > { %1107 = vmatprep.mubr.msk.bf16.mxu1 %vm1177_vm4, %v1176_v63 }
 0x354   : > { %v1093_v42 = vpop.f32.mrf.mxu1 }
 0x355   : > { %v730_v43 = vadd.f32 %v1093_v42, %v664_v40 }
 0x356   : > { %v721_v45 = vpop.f32.mrf.mxu1 }
 0x357   : > { %v722_v46 = vadd.f32 %v721_v45, %v654_v44  ;;  %v742_v48 = vmul.f32 0.2, %v730_v43  ;;  %vm738_vm15 = vcmp.ge.f32.partialorder %v730_v43, 0.0 }
 0x358   : > { %v1094_v47 = vpop.f32.mrf.mxu1 }
 0x359   : > { %v733_v49 = vadd.f32 %v1094_v47, %v669_v41  ;;  %v740_v52 = vmul.f32 0.2, %v722_v46  ;;  %vm736_vm1 = vcmp.ge.f32.partialorder %v722_v46, 0.0  ;;  %v746_v56 = vsel %vm738_vm15, %v730_v43, %v742_v48 }
 0x35a   : > { %v724_v51 = vpop.f32.mrf.mxu1 }
 0x35b   : > { %vm739_vm0 = vcmp.ge.f32.partialorder %v733_v49, 0.0  ;;  %v743_v53 = vmul.f32 0.2, %v733_v49  ;;  %v725_v54 = vadd.f32 %v724_v51, %v659_v50  ;;  %v744_v59 = vsel %vm736_vm1, %v722_v46, %v740_v52 }
 0x35d   : > { %vm737_vm3 = vcmp.ge.f32.partialorder %v725_v54, 0.0  ;;  %v741_v55 = vmul.f32 0.2, %v725_v54  ;;  %v747_v57 = vsel %vm739_vm0, %v733_v49, %v743_v53 }
 0x35e   : > { %v754_v58 = vpack.c.bf16 %v747_v57, %v746_v56 }
 0x35f   : > { %v745_v60 = vsel %vm737_vm3, %v725_v54, %v741_v55 }
 0x360   : > { %1095 = vmatprep.subr.bf16.mxu0 %v754_v58  ;;  %v753_v61 = vpack.c.bf16 %v745_v60, %v744_v59 }
 0x361   : > { %1096 = vmatpush3.bf16.msra.mxu0 %v754_v58 }
 0x362   : > { %1097 = vmatprep.subr.bf16.mxu0 %v753_v61 }
 0x365   : > { %1098 = vmatpush3.bf16.msra.mxu0 %v753_v61 }
 0x368   : > { %1100 = vmatmul.mubr.msk.bf16.vlgmr.msra.gmra.mxu0 %vm458_vm2, %v1150_v62 }
 0x428   : > { %v1101_v2 = vpop.f32.mrf.mxu0 }
 0x429   : > { %v839_v3 = vadd.f32 %v1101_v2, %v773_v0 }
 0x42a   : > { %v830_v5 = vpop.f32.mrf.mxu0 }
 0x42b   : > { %vm847_vm5 = vcmp.ge.f32.partialorder %v839_v3, 0.0  ;;  %v851_v6 = vmul.f32 0.2, %v839_v3  ;;  %v831_v7 = vadd.f32 %v830_v5, %v763_v4 }
 0x42c   : > { %v1102_v8 = vpop.f32.mrf.mxu0 }
 0x42d   : > { %v842_v9 = vadd.f32 %v1102_v8, %v778_v1  ;;  %v855_v11 = vsel %vm847_vm5, %v839_v3, %v851_v6  ;;  %v849_v13 = vmul.f32 0.2, %v831_v7  ;;  %vm845_vm7 = vcmp.ge.f32.partialorder %v831_v7, 0.0 }
 0x42e   : > { %v833_v12 = vpop.f32.mrf.mxu0  ;;  %v859_v18 = vadd.f32 %v855_v11, %v1346_v31 }
 0x42f   : > { %vm848_vm6 = vcmp.ge.f32.partialorder %v842_v9, 0.0  ;;  %v852_v14 = vmul.f32 0.2, %v842_v9  ;;  %v834_v15 = vadd.f32 %v833_v12, %v768_v10  ;;  %v853_v20 = vsel %vm845_vm7, %v831_v7, %v849_v13 }
 0x430   : > { %v857_v24 = vadd.f32 %v853_v20, %v1354_v35 }
 0x431   : > { %v856_v16 = vsel %vm848_vm6, %v842_v9, %v852_v14  ;;  %vm846_vm8 = vcmp.ge.f32.partialorder %v834_v15, 0.0  ;;  %v850_v17 = vmul.f32 0.2, %v834_v15 }
 0x432   : > { %v860_v19 = vadd.f32 %v856_v16, %v1349_v32 }
 0x433   : > { %v854_v21 = vsel %vm846_vm8, %v834_v15, %v850_v17 }
 0x434   : > { %v858_v22 = vadd.f32 %v854_v21, %v1357_v36  ;;  %v863_v23 = vpack.c.bf16 %v860_v19, %v859_v18 }
 0x436   : > { %1104 = vmatpush3.bf16.msra.mxu1 %v863_v23  ;;  %v862_v25 = vpack.c.bf16 %v858_v22, %v857_v24 }
 0x437   : > { %1105 = vmatprep.subr.bf16.mxu1 %v1176_v63 }
 0x43a   : > { %1106 = vmatpush3.bf16.msra.mxu1 %v862_v25 }
 0x43d   : > { %1108 = vmatmul.mubr.msk.bf16.vlgmr.msra.gmra.mxu1 %vm458_vm2, %v861_v26 }
 0x4fd   : > { %v907_v28 = vpop.f32.mrf.mxu1 }
 0x4fe   : > { %v908_v29 = vadd.f32 %v907_v28, %v868_v27 }
 0x4ff   : > { %v1109_v30 = vpop.f32.mrf.mxu1 }
 0x500   : > { %914 = vst.msk [vmem:[%s304_s19] sm:$0x3f] %vm913_vm9, %v908_v29 }
 0x501   : > { %v910_v31 = vpop.f32.mrf.mxu1 }
 0x503   : > { %v1110_v32 = vpop.f32.mrf.mxu1 }
 0x504 PF: > { %s17_s26 = sadd.s32 1, %s1173_s26   ;;  %s1402_s24 = smov %s1169_s25 }
 0x505   : > { %p14_p5 = scmp.ge.s32.totalorder %s17_s26, 4   ;;  %s1403_s25 = smov %s1405_s27 }
 0x507   :  { %16 = sbr.rel (!%p14_p5) target bundleno = 2 (0x2), region = 84 }

</bundles_post_ra>
